<compile_context>
chip_gen: v6e
topology: v6e:2x2x1
jax: 0.10.0
libtpu: 0.0.40
codegen_flags: <defaults>
</compile_context>

<pallas_src>
import jax
import jax.numpy as jnp
from jax.experimental import pallas as pl
from jax.experimental.pallas import tpu as pltpu

# ---- Config (stand-in for SAmodel.Config) ----
EMB = 32       # Config.embedding_dim
HID = 32       # Config.hidden_dim
NUM_DIR = 1    # Config.num_direction (unidirectional)
VOCAB = 16
TAG = 4
BATCH = 2
SEQ = 8


def lstm_kernel(x_ref, w_ih_ref, w_hh_ref, b_ref, w_cls_ref, b_cls_ref,
                out_ref):
    # x_ref:     (SEQ*BATCH, EMB)  time-major embedded tokens, row t*B+b
    # w_ih_ref:  (EMB, 4*HID)      pre-transposed, lane-dense (last dim 128)
    # w_hh_ref:  (HID, 4*HID)      pre-transposed, lane-dense
    # b_ref:     (1, 4*HID)        b_ih + b_hh
    # w_cls_ref: (HID, TAG)        pre-transposed classifier weight
    # b_cls_ref: (1, TAG)
    # out_ref:   (BATCH, TAG)

    # --- Input projection for ALL timesteps: one MXU call, no sequential dep.
    # (SEQ*BATCH, EMB) @ (EMB, 4H) + bias  ->  (SEQ*BATCH, 4H)
    gates_x = (jnp.dot(x_ref[...], w_ih_ref[...],
                       preferred_element_type=jnp.float32)
               + b_ref[...])

    w_hh_t = w_hh_ref[...]                      # (HID, 4H), loaded once

    # Lane mask for the g-gate (tanh) lanes; hoisted out of the recurrence.
    lane = jax.lax.broadcasted_iota(jnp.int32, (BATCH, 4 * HID), 1)
    g_lanes = (lane >= 2 * HID) & (lane < 3 * HID)

    h = jnp.zeros((BATCH, HID), jnp.float32)
    c = jnp.zeros((BATCH, HID), jnp.float32)

    # --- Recurrence: SEQ is a small static constant, so fully unroll at trace
    # time (equivalent to lax.fori_loop(..., unroll=True) but keeps every
    # gates_x row slice static).  Only the (h, c) carry is sequential.
    for t in range(SEQ):
        gates = (gates_x[t * BATCH:(t + 1) * BATCH, :]
                 + jnp.dot(h, w_hh_t, preferred_element_type=jnp.float32))

        # Full-width activations: sigmoid over all 128 lanes, tanh over all
        # 128 lanes, one select picks tanh for the g-gate lanes.
        act = jnp.where(g_lanes, jnp.tanh(gates), jax.nn.sigmoid(gates))

        # PyTorch gate order: i, f, g, o
        i = act[:, 0 * HID:1 * HID]
        f = act[:, 1 * HID:2 * HID]
        g = act[:, 2 * HID:3 * HID]
        o = act[:, 3 * HID:4 * HID]

        c = f * c + i * g
        h = o * jnp.tanh(c)

    # out = out[-1] ; classify(out)
    out_ref[...] = (jnp.dot(h, w_cls_ref[...],
                            preferred_element_type=jnp.float32)
                    + b_cls_ref[...]).astype(out_ref.dtype)


def lstm_forward(tokens, params):
    embed, w_ih, w_hh, b_ih, b_hh, w_cls, b_cls = params

    # Glue: embedding gather + permute(1, 0, 2) to time-major, then flatten
    # (SEQ, BATCH, EMB) -> (SEQ*BATCH, EMB) so the input projection is a
    # single 2-D matmul inside the kernel.
    x = jnp.take(embed, tokens, axis=0)          # (B, S, EMB)
    x = jnp.transpose(x, (1, 0, 2))              # (S, B, EMB)
    x_flat = x.reshape(SEQ * BATCH, EMB)         # (S*B, EMB)

    # Pre-transpose weights to lane-dense layouts (last dim 4H = 128 / TAG).
    w_ih_t = jnp.transpose(w_ih)                 # (EMB, 4H)
    w_hh_t = jnp.transpose(w_hh)                 # (HID, 4H)
    w_cls_t = jnp.transpose(w_cls)               # (HID, TAG)
    b_comb = (b_ih + b_hh).reshape(1, 4 * HID)   # (1, 4H)
    b_cls2 = b_cls.reshape(1, TAG)               # (1, TAG)

    vmem = pl.BlockSpec(memory_space=pltpu.MemorySpace.VMEM)

    # Single invocation: no grid, every operand is one whole-array VMEM block.
    # NOTE: at BATCH=2 the kernel is latency/overhead-bound; if batch grows,
    # tile batch (toward 8-row sublane tiles), never the sequential time axis.
    out = pl.pallas_call(
        lstm_kernel,
        out_shape=jax.ShapeDtypeStruct((BATCH, TAG), jnp.float32),
        in_specs=[vmem] * 6,
        out_specs=vmem,
    )(x_flat, w_ih_t, w_hh_t, b_comb, w_cls_t, b_cls2)
    return out


def reference_forward(tokens, params):
    """Pure-JAX reference (matches PyTorch nn.LSTM semantics)."""
    embed, w_ih, w_hh, b_ih, b_hh, w_cls, b_cls = params
    x = jnp.take(embed, tokens, axis=0)
    x = jnp.transpose(x, (1, 0, 2))  # (S, B, E)

    def step(carry, x_t):
        h, c = carry
        gates = x_t @ w_ih.T + b_ih + h @ w_hh.T + b_hh
        i = jax.nn.sigmoid(gates[:, 0 * HID:1 * HID])
        f = jax.nn.sigmoid(gates[:, 1 * HID:2 * HID])
        g = jnp.tanh(gates[:, 2 * HID:3 * HID])
        o = jax.nn.sigmoid(gates[:, 3 * HID:4 * HID])
        c = f * c + i * g
        h = o * jnp.tanh(c)
        return (h, c), h

    h0 = jnp.zeros((BATCH, HID), jnp.float32)
    c0 = jnp.zeros((BATCH, HID), jnp.float32)
    (h_last, _), _ = jax.lax.scan(step, (h0, c0), x)
    return h_last @ w_cls.T + b_cls


if __name__ == "__main__":
    key = jax.random.PRNGKey(0)
    k = jax.random.split(key, 8)

    embed = jax.random.normal(k[0], (VOCAB, EMB), jnp.float32) * 0.1
    w_ih = jax.random.normal(k[1], (4 * HID, EMB), jnp.float32) * 0.1
    w_hh = jax.random.normal(k[2], (4 * HID, HID), jnp.float32) * 0.1
    b_ih = jax.random.normal(k[3], (4 * HID,), jnp.float32) * 0.1
    b_hh = jax.random.normal(k[4], (4 * HID,), jnp.float32) * 0.1
    w_cls = jax.random.normal(k[5], (TAG, HID * NUM_DIR), jnp.float32) * 0.1
    b_cls = jax.random.normal(k[6], (TAG,), jnp.float32) * 0.1
    params = (embed, w_ih, w_hh, b_ih, b_hh, w_cls, b_cls)

    tokens = jax.random.randint(k[7], (BATCH, SEQ), 0, VOCAB, dtype=jnp.int32)

    out = lstm_forward(tokens, params)
    out = jax.block_until_ready(out)

    ref = reference_forward(tokens, params)
    assert out.shape == (BATCH, TAG)
    assert jnp.allclose(out, ref, atol=1e-4), "mismatch vs JAX reference"

    print("KERNEL_OK")
</pallas_src>

<mosaic_0001>
module attributes {stable_mosaic.version = 11 : i64} {
  func.func @lstm_kernel(%arg0: memref<16x32xf32, #tpu.memory_space<vmem>>, %arg1: memref<32x128xf32, #tpu.memory_space<vmem>>, %arg2: memref<32x128xf32, #tpu.memory_space<vmem>>, %arg3: memref<1x128xf32, #tpu.memory_space<vmem>>, %arg4: memref<32x4xf32, #tpu.memory_space<vmem>>, %arg5: memref<1x4xf32, #tpu.memory_space<vmem>>, %arg6: memref<2x4xf32, #tpu.memory_space<vmem>>) attributes {dimension_semantics = [], scalar_prefetch = 0 : i64, scratch_operands = 0 : i64, tpu.core_type = #tpu.core_type<tc>} {
    %c0 = arith.constant 0 : index
    %c0_0 = arith.constant 0 : index
    %0 = vector.load %arg0[%c0, %c0_0] : memref<16x32xf32, #tpu.memory_space<vmem>>, vector<16x32xf32>
    %c0_1 = arith.constant 0 : index
    %c0_2 = arith.constant 0 : index
    %1 = vector.load %arg1[%c0_1, %c0_2] : memref<32x128xf32, #tpu.memory_space<vmem>>, vector<32x128xf32>
    %cst = arith.constant dense<0.000000e+00> : vector<16x128xf32>
    %2 = tpu.matmul %0, %1, %cst {dimension_numbers = #tpu.dot_dimension_numbers<[1], [0], [0], [1], [0, 0, 1, 1], [], []>} : vector<16x32xf32>, vector<32x128xf32>, vector<16x128xf32> -> vector<16x128xf32>
    %c0_3 = arith.constant 0 : index
    %c0_4 = arith.constant 0 : index
    %3 = vector.load %arg3[%c0_3, %c0_4] : memref<1x128xf32, #tpu.memory_space<vmem>>, vector<1x128xf32>
    %4 = vector.broadcast %3 : vector<1x128xf32> to vector<16x128xf32>
    %5 = arith.addf %2, %4 : vector<16x128xf32>
    %c0_5 = arith.constant 0 : index
    %c0_6 = arith.constant 0 : index
    %6 = vector.load %arg2[%c0_5, %c0_6] : memref<32x128xf32, #tpu.memory_space<vmem>>, vector<32x128xf32>
    %7 = tpu.iota {dimensions = array<i32: 1>} : vector<2x128xi32>
    %c64_i32 = arith.constant 64 : i32
    %8 = vector.broadcast %c64_i32 : i32 to vector<2x128xi32>
    %9 = arith.cmpi sge, %7, %8 : vector<2x128xi32>
    %c96_i32 = arith.constant 96 : i32
    %10 = vector.broadcast %c96_i32 : i32 to vector<2x128xi32>
    %11 = arith.cmpi slt, %7, %10 : vector<2x128xi32>
    %12 = arith.andi %9, %11 : vector<2x128xi1>
    %cst_7 = arith.constant 0.000000e+00 : f32
    %13 = vector.broadcast %cst_7 : f32 to vector<2x32xf32>
    %cst_8 = arith.constant 0.000000e+00 : f32
    %14 = vector.broadcast %cst_8 : f32 to vector<2x32xf32>
    %15 = vector.extract_strided_slice %5 {offsets = [0, 0], sizes = [2, 128], strides = [1, 1]} : vector<16x128xf32> to vector<2x128xf32>
    %cst_9 = arith.constant dense<0.000000e+00> : vector<2x128xf32>
    %16 = tpu.matmul %13, %6, %cst_9 {dimension_numbers = #tpu.dot_dimension_numbers<[1], [0], [0], [1], [0, 0, 1, 1], [], []>} : vector<2x32xf32>, vector<32x128xf32>, vector<2x128xf32> -> vector<2x128xf32>
    %17 = arith.addf %15, %16 : vector<2x128xf32>
    %18 = math.tanh %17 : vector<2x128xf32>
    %19 = arith.negf %17 : vector<2x128xf32>
    %20 = math.exp %19 : vector<2x128xf32>
    %cst_10 = arith.constant 1.000000e+00 : f32
    %21 = vector.broadcast %cst_10 : f32 to vector<2x128xf32>
    %22 = arith.addf %21, %20 : vector<2x128xf32>
    %23 = arith.divf %21, %22 : vector<2x128xf32>
    %24 = arith.select %12, %18, %23 : vector<2x128xi1>, vector<2x128xf32>
    %25 = vector.extract_strided_slice %24 {offsets = [0, 0], sizes = [2, 32], strides = [1, 1]} : vector<2x128xf32> to vector<2x32xf32>
    %26 = vector.extract_strided_slice %24 {offsets = [0, 32], sizes = [2, 32], strides = [1, 1]} : vector<2x128xf32> to vector<2x32xf32>
    %27 = vector.extract_strided_slice %24 {offsets = [0, 64], sizes = [2, 32], strides = [1, 1]} : vector<2x128xf32> to vector<2x32xf32>
    %28 = vector.extract_strided_slice %24 {offsets = [0, 96], sizes = [2, 32], strides = [1, 1]} : vector<2x128xf32> to vector<2x32xf32>
    %29 = arith.mulf %26, %14 : vector<2x32xf32>
    %30 = arith.mulf %25, %27 : vector<2x32xf32>
    %31 = arith.addf %29, %30 : vector<2x32xf32>
    %32 = math.tanh %31 : vector<2x32xf32>
    %33 = arith.mulf %28, %32 : vector<2x32xf32>
    %34 = vector.extract_strided_slice %5 {offsets = [2, 0], sizes = [2, 128], strides = [1, 1]} : vector<16x128xf32> to vector<2x128xf32>
    %cst_11 = arith.constant dense<0.000000e+00> : vector<2x128xf32>
    %35 = tpu.matmul %33, %6, %cst_11 {dimension_numbers = #tpu.dot_dimension_numbers<[1], [0], [0], [1], [0, 0, 1, 1], [], []>} : vector<2x32xf32>, vector<32x128xf32>, vector<2x128xf32> -> vector<2x128xf32>
    %36 = arith.addf %34, %35 : vector<2x128xf32>
    %37 = math.tanh %36 : vector<2x128xf32>
    %38 = arith.negf %36 : vector<2x128xf32>
    %39 = math.exp %38 : vector<2x128xf32>
    %cst_12 = arith.constant 1.000000e+00 : f32
    %40 = vector.broadcast %cst_12 : f32 to vector<2x128xf32>
    %41 = arith.addf %40, %39 : vector<2x128xf32>
    %42 = arith.divf %40, %41 : vector<2x128xf32>
    %43 = arith.select %12, %37, %42 : vector<2x128xi1>, vector<2x128xf32>
    %44 = vector.extract_strided_slice %43 {offsets = [0, 0], sizes = [2, 32], strides = [1, 1]} : vector<2x128xf32> to vector<2x32xf32>
    %45 = vector.extract_strided_slice %43 {offsets = [0, 32], sizes = [2, 32], strides = [1, 1]} : vector<2x128xf32> to vector<2x32xf32>
    %46 = vector.extract_strided_slice %43 {offsets = [0, 64], sizes = [2, 32], strides = [1, 1]} : vector<2x128xf32> to vector<2x32xf32>
    %47 = vector.extract_strided_slice %43 {offsets = [0, 96], sizes = [2, 32], strides = [1, 1]} : vector<2x128xf32> to vector<2x32xf32>
    %48 = arith.mulf %45, %31 : vector<2x32xf32>
    %49 = arith.mulf %44, %46 : vector<2x32xf32>
    %50 = arith.addf %48, %49 : vector<2x32xf32>
    %51 = math.tanh %50 : vector<2x32xf32>
    %52 = arith.mulf %47, %51 : vector<2x32xf32>
    %53 = vector.extract_strided_slice %5 {offsets = [4, 0], sizes = [2, 128], strides = [1, 1]} : vector<16x128xf32> to vector<2x128xf32>
    %cst_13 = arith.constant dense<0.000000e+00> : vector<2x128xf32>
    %54 = tpu.matmul %52, %6, %cst_13 {dimension_numbers = #tpu.dot_dimension_numbers<[1], [0], [0], [1], [0, 0, 1, 1], [], []>} : vector<2x32xf32>, vector<32x128xf32>, vector<2x128xf32> -> vector<2x128xf32>
    %55 = arith.addf %53, %54 : vector<2x128xf32>
    %56 = math.tanh %55 : vector<2x128xf32>
    %57 = arith.negf %55 : vector<2x128xf32>
    %58 = math.exp %57 : vector<2x128xf32>
    %cst_14 = arith.constant 1.000000e+00 : f32
    %59 = vector.broadcast %cst_14 : f32 to vector<2x128xf32>
    %60 = arith.addf %59, %58 : vector<2x128xf32>
    %61 = arith.divf %59, %60 : vector<2x128xf32>
    %62 = arith.select %12, %56, %61 : vector<2x128xi1>, vector<2x128xf32>
    %63 = vector.extract_strided_slice %62 {offsets = [0, 0], sizes = [2, 32], strides = [1, 1]} : vector<2x128xf32> to vector<2x32xf32>
    %64 = vector.extract_strided_slice %62 {offsets = [0, 32], sizes = [2, 32], strides = [1, 1]} : vector<2x128xf32> to vector<2x32xf32>
    %65 = vector.extract_strided_slice %62 {offsets = [0, 64], sizes = [2, 32], strides = [1, 1]} : vector<2x128xf32> to vector<2x32xf32>
    %66 = vector.extract_strided_slice %62 {offsets = [0, 96], sizes = [2, 32], strides = [1, 1]} : vector<2x128xf32> to vector<2x32xf32>
    %67 = arith.mulf %64, %50 : vector<2x32xf32>
    %68 = arith.mulf %63, %65 : vector<2x32xf32>
    %69 = arith.addf %67, %68 : vector<2x32xf32>
    %70 = math.tanh %69 : vector<2x32xf32>
    %71 = arith.mulf %66, %70 : vector<2x32xf32>
    %72 = vector.extract_strided_slice %5 {offsets = [6, 0], sizes = [2, 128], strides = [1, 1]} : vector<16x128xf32> to vector<2x128xf32>
    %cst_15 = arith.constant dense<0.000000e+00> : vector<2x128xf32>
    %73 = tpu.matmul %71, %6, %cst_15 {dimension_numbers = #tpu.dot_dimension_numbers<[1], [0], [0], [1], [0, 0, 1, 1], [], []>} : vector<2x32xf32>, vector<32x128xf32>, vector<2x128xf32> -> vector<2x128xf32>
    %74 = arith.addf %72, %73 : vector<2x128xf32>
    %75 = math.tanh %74 : vector<2x128xf32>
    %76 = arith.negf %74 : vector<2x128xf32>
    %77 = math.exp %76 : vector<2x128xf32>
    %cst_16 = arith.constant 1.000000e+00 : f32
    %78 = vector.broadcast %cst_16 : f32 to vector<2x128xf32>
    %79 = arith.addf %78, %77 : vector<2x128xf32>
    %80 = arith.divf %78, %79 : vector<2x128xf32>
    %81 = arith.select %12, %75, %80 : vector<2x128xi1>, vector<2x128xf32>
    %82 = vector.extract_strided_slice %81 {offsets = [0, 0], sizes = [2, 32], strides = [1, 1]} : vector<2x128xf32> to vector<2x32xf32>
    %83 = vector.extract_strided_slice %81 {offsets = [0, 32], sizes = [2, 32], strides = [1, 1]} : vector<2x128xf32> to vector<2x32xf32>
    %84 = vector.extract_strided_slice %81 {offsets = [0, 64], sizes = [2, 32], strides = [1, 1]} : vector<2x128xf32> to vector<2x32xf32>
    %85 = vector.extract_strided_slice %81 {offsets = [0, 96], sizes = [2, 32], strides = [1, 1]} : vector<2x128xf32> to vector<2x32xf32>
    %86 = arith.mulf %83, %69 : vector<2x32xf32>
    %87 = arith.mulf %82, %84 : vector<2x32xf32>
    %88 = arith.addf %86, %87 : vector<2x32xf32>
    %89 = math.tanh %88 : vector<2x32xf32>
    %90 = arith.mulf %85, %89 : vector<2x32xf32>
    %91 = vector.extract_strided_slice %5 {offsets = [8, 0], sizes = [2, 128], strides = [1, 1]} : vector<16x128xf32> to vector<2x128xf32>
    %cst_17 = arith.constant dense<0.000000e+00> : vector<2x128xf32>
    %92 = tpu.matmul %90, %6, %cst_17 {dimension_numbers = #tpu.dot_dimension_numbers<[1], [0], [0], [1], [0, 0, 1, 1], [], []>} : vector<2x32xf32>, vector<32x128xf32>, vector<2x128xf32> -> vector<2x128xf32>
    %93 = arith.addf %91, %92 : vector<2x128xf32>
    %94 = math.tanh %93 : vector<2x128xf32>
    %95 = arith.negf %93 : vector<2x128xf32>
    %96 = math.exp %95 : vector<2x128xf32>
    %cst_18 = arith.constant 1.000000e+00 : f32
    %97 = vector.broadcast %cst_18 : f32 to vector<2x128xf32>
    %98 = arith.addf %97, %96 : vector<2x128xf32>
    %99 = arith.divf %97, %98 : vector<2x128xf32>
    %100 = arith.select %12, %94, %99 : vector<2x128xi1>, vector<2x128xf32>
    %101 = vector.extract_strided_slice %100 {offsets = [0, 0], sizes = [2, 32], strides = [1, 1]} : vector<2x128xf32> to vector<2x32xf32>
    %102 = vector.extract_strided_slice %100 {offsets = [0, 32], sizes = [2, 32], strides = [1, 1]} : vector<2x128xf32> to vector<2x32xf32>
    %103 = vector.extract_strided_slice %100 {offsets = [0, 64], sizes = [2, 32], strides = [1, 1]} : vector<2x128xf32> to vector<2x32xf32>
    %104 = vector.extract_strided_slice %100 {offsets = [0, 96], sizes = [2, 32], strides = [1, 1]} : vector<2x128xf32> to vector<2x32xf32>
    %105 = arith.mulf %102, %88 : vector<2x32xf32>
    %106 = arith.mulf %101, %103 : vector<2x32xf32>
    %107 = arith.addf %105, %106 : vector<2x32xf32>
    %108 = math.tanh %107 : vector<2x32xf32>
    %109 = arith.mulf %104, %108 : vector<2x32xf32>
    %110 = vector.extract_strided_slice %5 {offsets = [10, 0], sizes = [2, 128], strides = [1, 1]} : vector<16x128xf32> to vector<2x128xf32>
    %cst_19 = arith.constant dense<0.000000e+00> : vector<2x128xf32>
    %111 = tpu.matmul %109, %6, %cst_19 {dimension_numbers = #tpu.dot_dimension_numbers<[1], [0], [0], [1], [0, 0, 1, 1], [], []>} : vector<2x32xf32>, vector<32x128xf32>, vector<2x128xf32> -> vector<2x128xf32>
    %112 = arith.addf %110, %111 : vector<2x128xf32>
    %113 = math.tanh %112 : vector<2x128xf32>
    %114 = arith.negf %112 : vector<2x128xf32>
    %115 = math.exp %114 : vector<2x128xf32>
    %cst_20 = arith.constant 1.000000e+00 : f32
    %116 = vector.broadcast %cst_20 : f32 to vector<2x128xf32>
    %117 = arith.addf %116, %115 : vector<2x128xf32>
    %118 = arith.divf %116, %117 : vector<2x128xf32>
    %119 = arith.select %12, %113, %118 : vector<2x128xi1>, vector<2x128xf32>
    %120 = vector.extract_strided_slice %119 {offsets = [0, 0], sizes = [2, 32], strides = [1, 1]} : vector<2x128xf32> to vector<2x32xf32>
    %121 = vector.extract_strided_slice %119 {offsets = [0, 32], sizes = [2, 32], strides = [1, 1]} : vector<2x128xf32> to vector<2x32xf32>
    %122 = vector.extract_strided_slice %119 {offsets = [0, 64], sizes = [2, 32], strides = [1, 1]} : vector<2x128xf32> to vector<2x32xf32>
    %123 = vector.extract_strided_slice %119 {offsets = [0, 96], sizes = [2, 32], strides = [1, 1]} : vector<2x128xf32> to vector<2x32xf32>
    %124 = arith.mulf %121, %107 : vector<2x32xf32>
    %125 = arith.mulf %120, %122 : vector<2x32xf32>
    %126 = arith.addf %124, %125 : vector<2x32xf32>
    %127 = math.tanh %126 : vector<2x32xf32>
    %128 = arith.mulf %123, %127 : vector<2x32xf32>
    %129 = vector.extract_strided_slice %5 {offsets = [12, 0], sizes = [2, 128], strides = [1, 1]} : vector<16x128xf32> to vector<2x128xf32>
    %cst_21 = arith.constant dense<0.000000e+00> : vector<2x128xf32>
    %130 = tpu.matmul %128, %6, %cst_21 {dimension_numbers = #tpu.dot_dimension_numbers<[1], [0], [0], [1], [0, 0, 1, 1], [], []>} : vector<2x32xf32>, vector<32x128xf32>, vector<2x128xf32> -> vector<2x128xf32>
    %131 = arith.addf %129, %130 : vector<2x128xf32>
    %132 = math.tanh %131 : vector<2x128xf32>
    %133 = arith.negf %131 : vector<2x128xf32>
    %134 = math.exp %133 : vector<2x128xf32>
    %cst_22 = arith.constant 1.000000e+00 : f32
    %135 = vector.broadcast %cst_22 : f32 to vector<2x128xf32>
    %136 = arith.addf %135, %134 : vector<2x128xf32>
    %137 = arith.divf %135, %136 : vector<2x128xf32>
    %138 = arith.select %12, %132, %137 : vector<2x128xi1>, vector<2x128xf32>
    %139 = vector.extract_strided_slice %138 {offsets = [0, 0], sizes = [2, 32], strides = [1, 1]} : vector<2x128xf32> to vector<2x32xf32>
    %140 = vector.extract_strided_slice %138 {offsets = [0, 32], sizes = [2, 32], strides = [1, 1]} : vector<2x128xf32> to vector<2x32xf32>
    %141 = vector.extract_strided_slice %138 {offsets = [0, 64], sizes = [2, 32], strides = [1, 1]} : vector<2x128xf32> to vector<2x32xf32>
    %142 = vector.extract_strided_slice %138 {offsets = [0, 96], sizes = [2, 32], strides = [1, 1]} : vector<2x128xf32> to vector<2x32xf32>
    %143 = arith.mulf %140, %126 : vector<2x32xf32>
    %144 = arith.mulf %139, %141 : vector<2x32xf32>
    %145 = arith.addf %143, %144 : vector<2x32xf32>
    %146 = math.tanh %145 : vector<2x32xf32>
    %147 = arith.mulf %142, %146 : vector<2x32xf32>
    %148 = vector.extract_strided_slice %5 {offsets = [14, 0], sizes = [2, 128], strides = [1, 1]} : vector<16x128xf32> to vector<2x128xf32>
    %cst_23 = arith.constant dense<0.000000e+00> : vector<2x128xf32>
    %149 = tpu.matmul %147, %6, %cst_23 {dimension_numbers = #tpu.dot_dimension_numbers<[1], [0], [0], [1], [0, 0, 1, 1], [], []>} : vector<2x32xf32>, vector<32x128xf32>, vector<2x128xf32> -> vector<2x128xf32>
    %150 = arith.addf %148, %149 : vector<2x128xf32>
    %151 = math.tanh %150 : vector<2x128xf32>
    %152 = arith.negf %150 : vector<2x128xf32>
    %153 = math.exp %152 : vector<2x128xf32>
    %cst_24 = arith.constant 1.000000e+00 : f32
    %154 = vector.broadcast %cst_24 : f32 to vector<2x128xf32>
    %155 = arith.addf %154, %153 : vector<2x128xf32>
    %156 = arith.divf %154, %155 : vector<2x128xf32>
    %157 = arith.select %12, %151, %156 : vector<2x128xi1>, vector<2x128xf32>
    %158 = vector.extract_strided_slice %157 {offsets = [0, 0], sizes = [2, 32], strides = [1, 1]} : vector<2x128xf32> to vector<2x32xf32>
    %159 = vector.extract_strided_slice %157 {offsets = [0, 32], sizes = [2, 32], strides = [1, 1]} : vector<2x128xf32> to vector<2x32xf32>
    %160 = vector.extract_strided_slice %157 {offsets = [0, 64], sizes = [2, 32], strides = [1, 1]} : vector<2x128xf32> to vector<2x32xf32>
    %161 = vector.extract_strided_slice %157 {offsets = [0, 96], sizes = [2, 32], strides = [1, 1]} : vector<2x128xf32> to vector<2x32xf32>
    %162 = arith.mulf %159, %145 : vector<2x32xf32>
    %163 = arith.mulf %158, %160 : vector<2x32xf32>
    %164 = arith.addf %162, %163 : vector<2x32xf32>
    %165 = math.tanh %164 : vector<2x32xf32>
    %166 = arith.mulf %161, %165 : vector<2x32xf32>
    %c0_25 = arith.constant 0 : index
    %c0_26 = arith.constant 0 : index
    %167 = vector.load %arg4[%c0_25, %c0_26] : memref<32x4xf32, #tpu.memory_space<vmem>>, vector<32x4xf32>
    %cst_27 = arith.constant dense<0.000000e+00> : vector<2x4xf32>
    %168 = tpu.matmul %166, %167, %cst_27 {dimension_numbers = #tpu.dot_dimension_numbers<[1], [0], [0], [1], [0, 0, 1, 1], [], []>} : vector<2x32xf32>, vector<32x4xf32>, vector<2x4xf32> -> vector<2x4xf32>
    %c0_28 = arith.constant 0 : index
    %c0_29 = arith.constant 0 : index
    %169 = vector.load %arg5[%c0_28, %c0_29] : memref<1x4xf32, #tpu.memory_space<vmem>>, vector<1x4xf32>
    %170 = vector.broadcast %169 : vector<1x4xf32> to vector<2x4xf32>
    %171 = arith.addf %168, %170 : vector<2x4xf32>
    %c0_30 = arith.constant 0 : index
    %c0_31 = arith.constant 0 : index
    %172 = vector.load %arg6[%c0_30, %c0_31] : memref<2x4xf32, #tpu.memory_space<vmem>>, vector<2x4xf32>
    tpu.vector_store %arg6[%c0_30, %c0_31], %171 {strides = array<i32>} : memref<2x4xf32, #tpu.memory_space<vmem>>, vector<2x4xf32>,
    return
  }
}

</mosaic_0001>

<bundles_post_ra>
// kernel: tpu_custom_call.1
= control target key start
LH: loop header
LB: loop body
LE: loop exit
PB: predicated region body
PF: predicated region fallthrough
CT: control target
= control target key end

     0   :  { %11 = vsyncpa [#allocation3], 0  ;;  %s1683_s0 = inlined_call_operand.hbm [shape: f32[16,32], index: 0, kind: input, shape index: {}]   ;;  %s1684_s1 = inlined_call_operand.vmem [shape: f32[32,128], index: 1, kind: input, shape index: {}]   ;;  %s1685_s2 = inlined_call_operand.hbm [shape: f32[32,128], index: 2, kind: input, shape index: {}]   ;;  %s1686_s3 = inlined_call_operand.vmem [shape: f32[1,128], index: 3, kind: input, shape index: {}]   ;;  %s1687_s4 = inlined_call_operand.vmem [shape: f32[32,4], index: 4, kind: input, shape index: {}]   ;;  %s1688_s5 = inlined_call_operand.vmem [shape: f32[1,4], index: 5, kind: input, shape index: {}]   ;;  %s1689_s6 = inlined_call_operand.hbm [shape: f32[2,4], index: 6, kind: output, shape index: {}]  }
   0x1   :  { %12 = vsyncpa [#allocation6], 0 }
   0x2   :  { %13 = vsyncpa [#allocation4], 0  ;;  %s1431_s21 = smov [#allocation2]  }
   0x3   :  { %s19_s22 = sshll.u32 %s1431_s21, 4  ;;  %s20_s22 = int_to_ptr.vmem [resolvable:$true] %s19_s22 }
   0x4   :  { %s1373_s23 = scalar_lea.vmem %s20_s22, 256  ;;  %p1378_p1 = scmp.lt.s32.totalorder %s20_s22, %s20_s22 }
   0x5   :  { %p1374_p0 = scmp.ne.s32.totalorder %s20_s22, %s1373_s23  ;;  %p1379_p2 = scmp.lt.s32.totalorder %s1373_s23, %s1373_s23 }
   0x7   :  { %p1380_p3 = por %p1379_p2, %p1378_p1 }
   0x9   :  { %p1381_p4 = pnand %p1380_p3, %p1374_p0 }
   0xb   :  { %1384 = shalt.err (!%p1381_p4)
}
   0xc   :  { %s1432_s24 = smov 128   ;;  %s1433_s25 = smov 8  }
   0xd   :  { %25 = dma.hbm_to_vmem [thread:$0]  %s1683_s0, 256, %s20_s22, [#allocation3], %s1432_s24, %s1432_s24, %s1433_s25  }
   0xe   :  { %s1434_s28 = smov [#allocation5]  }
   0xf   :  { %s33_s29 = sshll.u32 %s1434_s28, 4  ;;  %s34_s29 = int_to_ptr.vmem [resolvable:$true] %s33_s29 }
  0x10   :  { %s1393_s30 = scalar_lea.vmem %s34_s29, 512  ;;  %p1398_p6 = scmp.lt.s32.totalorder %s34_s29, %s34_s29 }
  0x11   :  { %p1394_p5 = scmp.ne.s32.totalorder %s34_s29, %s1393_s30  ;;  %p1399_p7 = scmp.lt.s32.totalorder %s1393_s30, %s1393_s30 }
  0x13   :  { %p1400_p8 = por %p1399_p7, %p1398_p6 }
  0x15   :  { %p1401_p9 = pnand %p1400_p8, %p1394_p5 }
  0x17   :  { %1404 = shalt.err (!%p1401_p9)
}
  0x18   :  { %39 = dma.hbm_to_vmem [thread:$0]  %s1685_s2, 512, %s34_s29, [#allocation6], %s1432_s24, %s1432_s24, %s1433_s25  }
  0x19   :  { %1425 = dma.done.wait [#allocation3], 256  }
  0x1a   :  { %1426 = vsyncadd [#allocation3], 4294967040 }
  0x1b   :  { %1427 = dma.done.wait [#allocation6], 512  }
  0x1c   :  { %1428 = vsyncadd [#allocation6], 4294966784  ;;  %v1435_v0 = vmov 0.0   ;;  %vm1436_vm0 = vmmov 0   ;;  %v57_v1 = vld [vmem:[%s1684_s1 + $0x18] sm:$0xff]  ;;  %v56_v2 = vld [vmem:[%s1684_s1 + $0x10] sm:$0xff]  ;;  %v151_v22 = vlaneseq }
  0x1d   :  { %1193 = vmatprep.subr.mxu1 %v1435_v0  ;;  %1201 = vmatprep.mubr.msk.f32.mxu1 %vm1436_vm0, %v1435_v0  ;;  %v1490_v3 = vld [vmem:[#allocation5 + $0x18] sm:$0xff]  ;;  %v1493_v4 = vld [vmem:[#allocation5 + $0x10] sm:$0xff]  ;;  %vm65_vm1 = vcmask 261120   ;;  %v1500_v7 = vld [vmem:[#allocation5 + $0x8] sm:$0xff]  ;;  %s1438_s16 = smov 32   ;;  %vm1093_vm5 = vcmask 25600  }
  0x1e   :  { %1182 = vmatprep.subr.mxu0 %v57_v1  ;;  %1194 = vmatpush3.msra.mxu1 %v1490_v3  ;;  %v55_v5 = vld [vmem:[%s1684_s1 + $0x8] sm:$0xff]  ;;  %v52_v6 = vld [vmem:[#allocation2] sm:$0xff]  ;;  %v1507_v9 = vld [vmem:[#allocation5] sm:$0xff]  ;;  %v152_v23 = vand.u32 127, %v151_v22 }
  0x1f   :  { %1183 = vmatpush3.msra.mxu0 %v57_v1  ;;  %1195 = vmatprep.subr.mxu1 %v1435_v0  ;;  %v54_v8 = vld [vmem:[%s1684_s1] sm:$0xff]  ;;  %v53_v10 = vld [vmem:[#allocation2 + $0x8] sm:$0xff]  ;;  %v1008_v24 = vld [vmem:[%s1687_s4 + $0x10] sm:$0xff] }
  0x20   :  { %1184 = vmatprep.subr.mxu0 %v56_v2  ;;  %1196 = vmatpush3.msra.mxu1 %v1493_v4  ;;  %v1111_v11 = vld [vmem:[%s1686_s3] ss:$0 sm:$0xff]  ;;  %vm153_vm2 = vcmp.ge.s32.totalorder %v152_v23, 64  ;;  %vm154_vm3 = vcmp.lt.s32.totalorder %v152_v23, 96  ;;  %s1437_s3 = smov 64  }
  0x21   :  { %1185 = vmatpush3.msra.mxu0 %v56_v2  ;;  %1197 = vmatprep.subr.mxu1 %v1435_v0  ;;  %vm1544_vm4 = vmand %vm153_vm2, %vm154_vm3 }
  0x22   :  { %1186 = vmatprep.subr.mxu0 %v55_v5  ;;  %1190 = vmatprep.mubr.msk.f32.mxu0 %vm65_vm1, %v52_v6 }
  0x23   :  { %1187 = vmatpush3.msra.mxu0 %v55_v5  ;;  %1198 = vmatpush3.msra.mxu1 %v1500_v7 }
  0x24   :  { %1188 = vmatprep.subr.mxu0 %v54_v8  ;;  %1199 = vmatprep.subr.mxu1 %v1435_v0 }
  0x25   :  { %1189 = vmatpush3.msra.mxu0 %v54_v8  ;;  %1200 = vmatpush3.msra.mxu1 %v1507_v9 }
  0x26   :  { %1191 = vmatmul.mubr.msk.f32.vlgmr.msra.gmra.mxu0 %vm65_vm1, %v53_v10  ;;  %1202 = vmatmul.mubr.f32.vlgmr.msra.gmra.mxu1 %v1435_v0 }
  0x27   :  { %1204 = vmatprep.subr.mxu0 %v1435_v0  ;;  %1212 = vmatprep.mubr.msk.f32.mxu0 %vm1436_vm0, %v1435_v0 }
  0x28   :  { %1205 = vmatpush3.msra.mxu0 %v1490_v3  ;;  %1215 = vmatprep.subr.mxu1 %v1435_v0 }
  0x29   :  { %1206 = vmatprep.subr.mxu0 %v1435_v0  ;;  %1216 = vmatpush3.msra.mxu1 %v1490_v3 }
  0x2a   :  { %1207 = vmatpush3.msra.mxu0 %v1493_v4  ;;  %1217 = vmatprep.subr.mxu1 %v1435_v0 }
  0x2b   :  { %1208 = vmatprep.subr.mxu0 %v1435_v0  ;;  %1218 = vmatpush3.msra.mxu1 %v1493_v4 }
  0x2c   :  { %1209 = vmatpush3.msra.mxu0 %v1500_v7  ;;  %1219 = vmatprep.subr.mxu1 %v1435_v0 }
  0x2d   :  { %1210 = vmatprep.subr.mxu0 %v1435_v0  ;;  %1220 = vmatpush3.msra.mxu1 %v1500_v7 }
  0x2e   :  { %1211 = vmatpush3.msra.mxu0 %v1507_v9  ;;  %1221 = vmatprep.subr.mxu1 %v1435_v0 }
  0x2f   :  { %1222 = vmatpush3.msra.mxu1 %v1507_v9  ;;  %1223 = vmatprep.mubr.msk.f32.mxu1 %vm1436_vm0, %v1435_v0 }
  0x30   :  { %1226 = vmatprep.subr.mxu0 %v1435_v0  ;;  %1237 = vmatprep.subr.mxu1 %v1435_v0 }
  0xe6   :  { %v1192_v12 = vpop.f32.mrf.mxu0  ;;  %v225_v13 = vpop.f32.mrf.mxu1 }
  0xe7   :  { %v1539_v14 = vadd.f32 %v1192_v12, %v1111_v11 }
  0xe8   :  { %v138_v15 = vpop.f32.mrf.mxu0  ;;  %v1203_v16 = vpop.f32.mrf.mxu1 }
  0xe9   :  { %v1541_v17 = vadd.f32 %v1111_v11, %v138_v15 }
  0xeb   :  { %v229_v18 = vadd.f32 %v225_v13, %v1541_v17 }
  0xed   :  { %v1114_v19 = vmul.f32 -1.442695, %v229_v18 }
  0xef   :  { %1301 = vpow2.f32 %v1114_v19 }
  0xf0   :  { %1303 = vtanh.f32 %v229_v18 }
  0xfc   :  { %v1302_v20 = vpop.eup %1301 }
  0xfd   :  { %v234_v21 = vadd.f32 1.0, %v1302_v20  ;;  %v1304_v25 = vpop.eup %1303 }
  0xff   :  { %1305 = vrcp.f32 %v234_v21 }
 0x10c   :  { %v1306_v26 = vpop.eup %1305 }
 0x10d   :  { %v237_v27 = vsel %vm1544_vm4, %v1304_v25, %v1306_v26 }
 0x10e   :  { %240 = vrot.lane.b32.xlu0 %v237_v27, %s1437_s3  ;;  %v238_v30 = vmul.f32 0.0, %v237_v27 }
 0x180   :  { %v241_v28 = vpop.permute.xlu0 %240 }
 0x181   :  { %v243_v29 = vmul.f32 %v241_v28, %v237_v27 }
 0x183   :  { %245 = vrot.lane.b32.xlu0 %v243_v29, %s1438_s16 }
 0x1f5   :  { %v246_v31 = vpop.permute.xlu0 %245 }
 0x1f6   :  { %v248_v32 = vadd.f32 %v246_v31, %v238_v30 }
 0x1f8   :  { %1307 = vtanh.f32 %v248_v32  ;;  %v343_v49 = vrot.slane %v248_v32, 6 }
 0x205   :  { %v1308_v33 = vpop.eup %1307 }
 0x206   :  { %251 = vrot.lane.b32.xlu1 %v1308_v33, %s1437_s3 }
 0x278   :  { %v252_v34 = vpop.permute.xlu1 %251 }
 0x279   :  { %v254_v35 = vmul.f32 %v252_v34, %v237_v27 }
 0x27b   :  { %256 = vrot.lane.b32.xlu1 %v254_v35, %s1438_s16 }
 0x2ed   :  { %v257_v36 = vpop.permute.xlu1 %256 }
 0x2ee   :  { %1213 = vmatmul.mubr.msk.f32.vlgmr.msra.gmra.mxu0 %vm65_vm1, %v257_v36 }
 0x2ef   :  { %1227 = vmatpush3.msra.mxu0 %v1490_v3  ;;  %1234 = vmatprep.mubr.msk.f32.mxu0 %vm1436_vm0, %v1435_v0 }
 0x2f0   :  { %1228 = vmatprep.subr.mxu0 %v1435_v0 }
 0x2f1   :  { %1229 = vmatpush3.msra.mxu0 %v1493_v4 }
 0x2f2   :  { %1230 = vmatprep.subr.mxu0 %v1435_v0 }
 0x2f3   :  { %1231 = vmatpush3.msra.mxu0 %v1500_v7 }
 0x2f4   :  { %1232 = vmatprep.subr.mxu0 %v1435_v0 }
 0x2f5   :  { %1233 = vmatpush3.msra.mxu0 %v1507_v9 }
 0x2f6   :  { %1248 = vmatprep.subr.mxu0 %v1435_v0 }
 0x3ae   :  { %v326_v37 = vpop.f32.mrf.mxu0 }
 0x3af   :  { %v331_v38 = vrot.slane %v326_v37, 6 }
 0x3b0   :  { %v1214_v39 = vpop.f32.mrf.mxu0 }
 0x3b1   :  { %v333_v40 = vadd.f32 %v331_v38, %v1541_v17 }
 0x3b3   :  { %v1116_v41 = vmul.f32 -1.442695, %v333_v40 }
 0x3b5   :  { %1309 = vpow2.f32 %v1116_v41 }
 0x3b6   :  { %1311 = vtanh.f32 %v333_v40 }
 0x3c2   :  { %v1310_v42 = vpop.eup %1309 }
 0x3c3   :  { %v338_v43 = vadd.f32 1.0, %v1310_v42  ;;  %v1312_v44 = vpop.eup %1311 }
 0x3c5   :  { %1313 = vrcp.f32 %v338_v43 }
 0x3d2   :  { %v1314_v45 = vpop.eup %1313 }
 0x3d3   :  { %v341_v46 = vsel %vm1544_vm4, %v1312_v44, %v1314_v45 }
 0x3d4   :  { %347 = vrot.lane.b32.xlu0 %v341_v46, %s1437_s3  ;;  %v345_v50 = vmul.f32 %v343_v49, %v341_v46 }
 0x446   :  { %v348_v47 = vpop.permute.xlu0 %347 }
 0x447   :  { %v350_v48 = vmul.f32 %v348_v47, %v341_v46 }
 0x449   :  { %352 = vrot.lane.b32.xlu1 %v350_v48, %s1438_s16 }
 0x4bb   :  { %v353_v51 = vpop.permute.xlu1 %352 }
 0x4bc   :  { %v355_v52 = vadd.f32 %v353_v51, %v345_v50 }
 0x4be   :  { %1315 = vtanh.f32 %v355_v52  ;;  %v451_v11 = vrot.slane %v355_v52, 6 }
 0x4cb   :  { %v1316_v53 = vpop.eup %1315 }
 0x4cc   :  { %358 = vrot.lane.b32.xlu0 %v1316_v53, %s1437_s3 }
 0x53e   :  { %v359_v54 = vpop.permute.xlu0 %358 }
 0x53f   :  { %v361_v55 = vmul.f32 %v359_v54, %v341_v46 }
 0x541   :  { %v363_v56 = vrot.slane %v361_v55, 2 }
 0x543   :  { %364 = vrot.lane.b32.xlu1 %v363_v56, %s1438_s16 }
 0x5b5   :  { %v365_v57 = vpop.permute.xlu1 %364 }
 0x5b6   :  { %1224 = vmatmul.mubr.msk.f32.vlgmr.msra.gmra.mxu1 %vm65_vm1, %v365_v57 }
 0x5b7   :  { %1238 = vmatpush3.msra.mxu1 %v1490_v3  ;;  %1245 = vmatprep.mubr.msk.f32.mxu1 %vm1436_vm0, %v1435_v0 }
 0x5b8   :  { %1239 = vmatprep.subr.mxu1 %v1435_v0 }
 0x5b9   :  { %1240 = vmatpush3.msra.mxu1 %v1493_v4 }
 0x5ba   :  { %1241 = vmatprep.subr.mxu1 %v1435_v0 }
 0x5bb   :  { %1242 = vmatpush3.msra.mxu1 %v1500_v7 }
 0x5bc   :  { %1243 = vmatprep.subr.mxu1 %v1435_v0 }
 0x5bd   :  { %1244 = vmatpush3.msra.mxu1 %v1507_v9 }
 0x5be   :  { %1259 = vmatprep.subr.mxu1 %v1435_v0 }
 0x676   :  { %v434_v58 = vpop.f32.mrf.mxu1 }
 0x677   :  { %v439_v59 = vrot.slane %v434_v58, 4 }
 0x678   :  { %v1225_v60 = vpop.f32.mrf.mxu1 }
 0x679   :  { %v441_v61 = vadd.f32 %v439_v59, %v1541_v17 }
 0x67b   :  { %v1118_v62 = vmul.f32 -1.442695, %v441_v61 }
 0x67d   :  { %1317 = vpow2.f32 %v1118_v62 }
 0x67e   :  { %1319 = vtanh.f32 %v441_v61 }
 0x68a   :  { %v1318_v63 = vpop.eup %1317 }
 0x68b   :  { %v446_v1 = vadd.f32 1.0, %v1318_v63  ;;  %v1320_v2 = vpop.eup %1319 }
 0x68d   :  { %1321 = vrcp.f32 %v446_v1 }
 0x69a   :  { %v1322_v5 = vpop.eup %1321 }
 0x69b   :  { %v449_v6 = vsel %vm1544_vm4, %v1320_v2, %v1322_v5 }
 0x69c   :  { %455 = vrot.lane.b32.xlu0 %v449_v6, %s1437_s3  ;;  %v453_v12 = vmul.f32 %v451_v11, %v449_v6 }
 0x70e   :  { %v456_v8 = vpop.permute.xlu0 %455 }
 0x70f   :  { %v458_v10 = vmul.f32 %v456_v8, %v449_v6 }
 0x711   :  { %460 = vrot.lane.b32.xlu1 %v458_v10, %s1438_s16 }
 0x783   :  { %v461_v13 = vpop.permute.xlu1 %460 }
 0x784   :  { %v463_v15 = vadd.f32 %v461_v13, %v453_v12 }
 0x786   :  { %1323 = vtanh.f32 %v463_v15  ;;  %v559_v35 = vrot.slane %v463_v15, 6 }
 0x793   :  { %v1324_v16 = vpop.eup %1323 }
 0x794   :  { %466 = vrot.lane.b32.xlu0 %v1324_v16, %s1437_s3 }
 0x806   :  { %v467_v18 = vpop.permute.xlu0 %466 }
 0x807   :  { %v469_v19 = vmul.f32 %v467_v18, %v449_v6 }
 0x809   :  { %v471_v20 = vrot.slane %v469_v19, 4 }
 0x80b   :  { %472 = vrot.lane.b32.xlu1 %v471_v20, %s1438_s16 }
 0x87d   :  { %v473_v21 = vpop.permute.xlu1 %472 }
 0x87e   :  { %1235 = vmatmul.mubr.msk.f32.vlgmr.msra.gmra.mxu0 %vm65_vm1, %v473_v21 }
 0x87f   :  { %1249 = vmatpush3.msra.mxu0 %v1490_v3  ;;  %1256 = vmatprep.mubr.msk.f32.mxu0 %vm1436_vm0, %v1435_v0 }
 0x880   :  { %1250 = vmatprep.subr.mxu0 %v1435_v0 }
 0x881   :  { %1251 = vmatpush3.msra.mxu0 %v1493_v4 }
 0x882   :  { %1252 = vmatprep.subr.mxu0 %v1435_v0 }
 0x883   :  { %1253 = vmatpush3.msra.mxu0 %v1500_v7 }
 0x884   :  { %1254 = vmatprep.subr.mxu0 %v1435_v0 }
 0x885   :  { %1255 = vmatpush3.msra.mxu0 %v1507_v9 }
 0x886   :  { %1270 = vmatprep.subr.mxu0 %v1435_v0 }
 0x93e   :  { %v542_v22 = vpop.f32.mrf.mxu0 }
 0x93f   :  { %v547_v23 = vrot.slane %v542_v22, 2 }
 0x940   :  { %v1236_v25 = vpop.f32.mrf.mxu0 }
 0x941   :  { %v549_v26 = vadd.f32 %v547_v23, %v1541_v17 }
 0x943   :  { %v1120_v27 = vmul.f32 -1.442695, %v549_v26 }
 0x945   :  { %1325 = vpow2.f32 %v1120_v27 }
 0x946   :  { %1327 = vtanh.f32 %v549_v26 }
 0x952   :  { %v1326_v28 = vpop.eup %1325 }
 0x953   :  { %v554_v29 = vadd.f32 1.0, %v1326_v28  ;;  %v1328_v30 = vpop.eup %1327 }
 0x955   :  { %1329 = vrcp.f32 %v554_v29 }
 0x962   :  { %v1330_v31 = vpop.eup %1329 }
 0x963   :  { %v557_v32 = vsel %vm1544_vm4, %v1328_v30, %v1330_v31 }
 0x964   :  { %563 = vrot.lane.b32.xlu0 %v557_v32, %s1437_s3  ;;  %v561_v36 = vmul.f32 %v559_v35, %v557_v32 }
 0x9d6   :  { %v564_v33 = vpop.permute.xlu0 %563 }
 0x9d7   :  { %v566_v34 = vmul.f32 %v564_v33, %v557_v32 }
 0x9d9   :  { %568 = vrot.lane.b32.xlu1 %v566_v34, %s1438_s16 }
 0xa4b   :  { %v569_v17 = vpop.permute.xlu1 %568 }
 0xa4c   :  { %v571_v37 = vadd.f32 %v569_v17, %v561_v36 }
 0xa4e   :  { %1331 = vtanh.f32 %v571_v37  ;;  %v664_v54 = vrot.slane %v571_v37, 6 }
 0xa5b   :  { %v1332_v38 = vpop.eup %1331 }
 0xa5c   :  { %574 = vrot.lane.b32.xlu0 %v1332_v38, %s1437_s3 }
 0xace   :  { %v575_v39 = vpop.permute.xlu0 %574 }
 0xacf   :  { %v577_v40 = vmul.f32 %v575_v39, %v557_v32 }
 0xad1   :  { %v579_v41 = vrot.slane %v577_v40, 6 }
 0xad3   :  { %580 = vrot.lane.b32.xlu1 %v579_v41, %s1438_s16 }
 0xb45   :  { %v581_v42 = vpop.permute.xlu1 %580 }
 0xb46   :  { %1246 = vmatmul.mubr.msk.f32.vlgmr.msra.gmra.mxu1 %vm65_vm1, %v581_v42 }
 0xb47   :  { %1260 = vmatpush3.msra.mxu1 %v1490_v3  ;;  %1267 = vmatprep.mubr.msk.f32.mxu1 %vm1436_vm0, %v1435_v0 }
 0xb48   :  { %1261 = vmatprep.subr.mxu1 %v1435_v0 }
 0xb49   :  { %1262 = vmatpush3.msra.mxu1 %v1493_v4 }
 0xb4a   :  { %1263 = vmatprep.subr.mxu1 %v1435_v0 }
 0xb4b   :  { %1264 = vmatpush3.msra.mxu1 %v1500_v7 }
 0xb4c   :  { %1265 = vmatprep.subr.mxu1 %v1435_v0 }
 0xb4d   :  { %1266 = vmatpush3.msra.mxu1 %v1507_v9 }
 0xb4e   :  { %1281 = vmatprep.subr.mxu1 %v1435_v0 }
 0xc06   :  { %v650_v43 = vpop.f32.mrf.mxu1 }
 0xc07   :  { %v654_v44 = vadd.f32 %v650_v43, %v1539_v14 }
 0xc08   :  { %v1247_v45 = vpop.f32.mrf.mxu1 }
 0xc09   :  { %v1122_v46 = vmul.f32 -1.442695, %v654_v44 }
 0xc0b   :  { %1333 = vpow2.f32 %v1122_v46 }
 0xc0c   :  { %1335 = vtanh.f32 %v654_v44 }
 0xc18   :  { %v1334_v47 = vpop.eup %1333 }
 0xc19   :  { %v659_v48 = vadd.f32 1.0, %v1334_v47  ;;  %v1336_v49 = vpop.eup %1335 }
 0xc1b   :  { %1337 = vrcp.f32 %v659_v48 }
 0xc28   :  { %v1338_v50 = vpop.eup %1337 }
 0xc29   :  { %v662_v51 = vsel %vm1544_vm4, %v1336_v49, %v1338_v50 }
 0xc2a   :  { %668 = vrot.lane.b32.xlu0 %v662_v51, %s1437_s3  ;;  %v666_v55 = vmul.f32 %v664_v54, %v662_v51 }
 0xc9c   :  { %v669_v52 = vpop.permute.xlu0 %668 }
 0xc9d   :  { %v671_v53 = vmul.f32 %v669_v52, %v662_v51 }
 0xc9f   :  { %673 = vrot.lane.b32.xlu1 %v671_v53, %s1438_s16 }
 0xd11   :  { %v674_v56 = vpop.permute.xlu1 %673 }
 0xd12   :  { %v676_v57 = vadd.f32 %v674_v56, %v666_v55 }
 0xd14   :  { %1339 = vtanh.f32 %v676_v57  ;;  %v771_v11 = vrot.slane %v676_v57, 6 }
 0xd21   :  { %v1340_v58 = vpop.eup %1339 }
 0xd22   :  { %679 = vrot.lane.b32.xlu0 %v1340_v58, %s1437_s3  ;;  %v1009_v58 = vld [vmem:[%s1687_s4 + $0x18] sm:$0xff] }
 0xd94   :  { %v680_v59 = vpop.permute.xlu0 %679 }
 0xd95   :  { %v682_v60 = vmul.f32 %v680_v59, %v662_v51  ;;  %v1007_v59 = vld [vmem:[%s1687_s4 + $0x8] sm:$0xff] }
 0xd97   :  { %684 = vrot.lane.b32.xlu1 %v682_v60, %s1438_s16  ;;  %v1006_v60 = vld [vmem:[%s1687_s4] sm:$0xff]  ;;  %s1439_s4 = smov [#allocation7]  }
 0xd98   :  { %s1101_s27 = sshll.u32 %s1439_s4, 4  ;;  %s1102_s27 = int_to_ptr.vmem [resolvable:$true] %s1101_s27 }
 0xd99   :  { %s1405_s28 = scalar_lea.vmem %s1102_s27, 32  ;;  %p1410_p11 = scmp.lt.s32.totalorder %s1102_s27, %s1102_s27 }
 0xd9a   :  { %p1406_p10 = scmp.ne.s32.totalorder %s1102_s27, %s1405_s28  ;;  %p1411_p12 = scmp.lt.s32.totalorder %s1405_s28, %s1405_s28 }
 0xd9c   :  { %p1412_p13 = por %p1411_p12, %p1410_p11 }
 0xd9e   :  { %p1413_p0 = pnand %p1412_p13, %p1406_p10 }
 0xe09   :  { %v685_v61 = vpop.permute.xlu1 %684 }
 0xe0a   :  { %1257 = vmatmul.mubr.msk.f32.vlgmr.msra.gmra.mxu0 %vm65_vm1, %v685_v61 }
 0xe0b   :  { %1271 = vmatpush3.msra.mxu0 %v1490_v3  ;;  %1278 = vmatprep.mubr.msk.f32.mxu0 %vm1436_vm0, %v1435_v0 }
 0xe0c   :  { %1272 = vmatprep.subr.mxu0 %v1435_v0 }
 0xe0d   :  { %1273 = vmatpush3.msra.mxu0 %v1493_v4 }
 0xe0e   :  { %1274 = vmatprep.subr.mxu0 %v1435_v0 }
 0xe0f   :  { %1275 = vmatpush3.msra.mxu0 %v1500_v7 }
 0xe10   :  { %1276 = vmatprep.subr.mxu0 %v1435_v0 }
 0xe11   :  { %1277 = vmatpush3.msra.mxu0 %v1507_v9 }
 0xeca   :  { %v754_v62 = vpop.f32.mrf.mxu0 }
 0xecb   :  { %v759_v63 = vrot.slane %v754_v62, 6 }
 0xecc   :  { %v1258_v1 = vpop.f32.mrf.mxu0 }
 0xecd   :  { %v761_v3 = vadd.f32 %v759_v63, %v1539_v14 }
 0xecf   :  { %v1124_v2 = vmul.f32 -1.442695, %v761_v3 }
 0xed1   :  { %1341 = vpow2.f32 %v1124_v2  ;;  %v1129_v2 = vld [vmem:[%s1688_s5] ss:$0 sm:$0xff] }
 0xed2   :  { %1343 = vtanh.f32 %v761_v3 }
 0xede   :  { %v1342_v5 = vpop.eup %1341 }
 0xedf   :  { %v766_v6 = vadd.f32 1.0, %v1342_v5  ;;  %v1344_v4 = vpop.eup %1343 }
 0xee1   :  { %1345 = vrcp.f32 %v766_v6 }
 0xeee   :  { %v1346_v8 = vpop.eup %1345 }
 0xeef   :  { %v769_v7 = vsel %vm1544_vm4, %v1344_v4, %v1346_v8 }
 0xef0   :  { %775 = vrot.lane.b32.xlu0 %v769_v7, %s1437_s3  ;;  %v773_v12 = vmul.f32 %v771_v11, %v769_v7 }
 0xf62   :  { %v776_v10 = vpop.permute.xlu0 %775 }
 0xf63   :  { %v778_v9 = vmul.f32 %v776_v10, %v769_v7 }
 0xf65   :  { %780 = vrot.lane.b32.xlu1 %v778_v9, %s1438_s16 }
 0xfd7   :  { %v781_v13 = vpop.permute.xlu1 %780 }
 0xfd8   :  { %v783_v15 = vadd.f32 %v781_v13, %v773_v12 }
 0xfda   :  { %1347 = vtanh.f32 %v783_v15  ;;  %v879_v35 = vrot.slane %v783_v15, 6 }
 0xfe7   :  { %v1348_v16 = vpop.eup %1347 }
 0xfe8   :  { %786 = vrot.lane.b32.xlu0 %v1348_v16, %s1437_s3 }
0x105a   :  { %v787_v18 = vpop.permute.xlu0 %786 }
0x105b   :  { %v789_v19 = vmul.f32 %v787_v18, %v769_v7 }
0x105d   :  { %v791_v20 = vrot.slane %v789_v19, 2 }
0x105f   :  { %792 = vrot.lane.b32.xlu1 %v791_v20, %s1438_s16 }
0x10d1   :  { %v793_v21 = vpop.permute.xlu1 %792 }
0x10d2   :  { %1268 = vmatmul.mubr.msk.f32.vlgmr.msra.gmra.mxu1 %vm65_vm1, %v793_v21 }
0x10d3   :  { %1289 = vmatprep.mubr.msk.f32.mxu1 %vm1436_vm0, %v1435_v0  ;;  %1282 = vmatpush3.msra.mxu1 %v1009_v58 }
0x10d4   :  { %1283 = vmatprep.subr.mxu1 %v1435_v0 }
0x10d5   :  { %1284 = vmatpush3.msra.mxu1 %v1008_v24 }
0x10d6   :  { %1285 = vmatprep.subr.mxu1 %v1435_v0 }
0x10d7   :  { %1286 = vmatpush3.msra.mxu1 %v1007_v59 }
0x10d8   :  { %1287 = vmatprep.subr.mxu1 %v1435_v0 }
0x10d9   :  { %1288 = vmatpush3.msra.mxu1 %v1006_v60 }
0x1192   :  { %v862_v22 = vpop.f32.mrf.mxu1 }
0x1193   :  { %v867_v23 = vrot.slane %v862_v22, 4 }
0x1194   :  { %v1269_v25 = vpop.f32.mrf.mxu1 }
0x1195   :  { %v869_v26 = vadd.f32 %v867_v23, %v1539_v14 }
0x1197   :  { %v1126_v27 = vmul.f32 -1.442695, %v869_v26 }
0x1199   :  { %1349 = vpow2.f32 %v1126_v27 }
0x119a   :  { %1351 = vtanh.f32 %v869_v26 }
0x11a6   :  { %v1350_v28 = vpop.eup %1349 }
0x11a7   :  { %v874_v29 = vadd.f32 1.0, %v1350_v28  ;;  %v1352_v30 = vpop.eup %1351 }
0x11a9   :  { %1353 = vrcp.f32 %v874_v29 }
0x11b6   :  { %v1354_v31 = vpop.eup %1353 }
0x11b7   :  { %v877_v32 = vsel %vm1544_vm4, %v1352_v30, %v1354_v31 }
0x11b8   :  { %883 = vrot.lane.b32.xlu0 %v877_v32, %s1437_s3  ;;  %v881_v36 = vmul.f32 %v879_v35, %v877_v32 }
0x122a   :  { %v884_v33 = vpop.permute.xlu0 %883 }
0x122b   :  { %v886_v34 = vmul.f32 %v884_v33, %v877_v32 }
0x122d   :  { %888 = vrot.lane.b32.xlu1 %v886_v34, %s1438_s16 }
0x129f   :  { %v889_v17 = vpop.permute.xlu1 %888 }
0x12a0   :  { %v891_v37 = vadd.f32 %v889_v17, %v881_v36 }
0x12a2   :  { %1355 = vtanh.f32 %v891_v37  ;;  %v987_v55 = vrot.slane %v891_v37, 6 }
0x12af   :  { %v1356_v38 = vpop.eup %1355 }
0x12b0   :  { %894 = vrot.lane.b32.xlu0 %v1356_v38, %s1437_s3 }
0x1322   :  { %v895_v39 = vpop.permute.xlu0 %894 }
0x1323   :  { %v897_v40 = vmul.f32 %v895_v39, %v877_v32 }
0x1325   :  { %v899_v41 = vrot.slane %v897_v40, 4 }
0x1327   :  { %900 = vrot.lane.b32.xlu1 %v899_v41, %s1438_s16 }
0x1399   :  { %v901_v42 = vpop.permute.xlu1 %900 }
0x139a   :  { %1279 = vmatmul.mubr.msk.f32.vlgmr.msra.gmra.mxu0 %vm65_vm1, %v901_v42 }
0x145a   :  { %v970_v43 = vpop.f32.mrf.mxu0 }
0x145b   :  { %v975_v44 = vrot.slane %v970_v43, 2 }
0x145c   :  { %v1280_v45 = vpop.f32.mrf.mxu0 }
0x145d   :  { %v977_v46 = vadd.f32 %v975_v44, %v1539_v14 }
0x145f   :  { %v1128_v47 = vmul.f32 -1.442695, %v977_v46 }
0x1461   :  { %1357 = vpow2.f32 %v1128_v47 }
0x1462   :  { %1359 = vtanh.f32 %v977_v46 }
0x146e   :  { %v1358_v48 = vpop.eup %1357 }
0x146f   :  { %v982_v49 = vadd.f32 1.0, %v1358_v48  ;;  %v1360_v50 = vpop.eup %1359 }
0x1471   :  { %1361 = vrcp.f32 %v982_v49 }
0x147e   :  { %v1362_v51 = vpop.eup %1361 }
0x147f   :  { %v985_v52 = vsel %vm1544_vm4, %v1360_v50, %v1362_v51 }
0x1480   :  { %991 = vrot.lane.b32.xlu0 %v985_v52, %s1437_s3  ;;  %v989_v56 = vmul.f32 %v987_v55, %v985_v52 }
0x14f2   :  { %v992_v53 = vpop.permute.xlu0 %991 }
0x14f3   :  { %v994_v54 = vmul.f32 %v992_v53, %v985_v52 }
0x14f5   :  { %996 = vrot.lane.b32.xlu1 %v994_v54, %s1438_s16 }
0x1567   :  { %v997_v14 = vpop.permute.xlu1 %996 }
0x1568   :  { %v999_v57 = vadd.f32 %v997_v14, %v989_v56 }
0x156a   :  { %1363 = vtanh.f32 %v999_v57 }
0x1577   :  { %v1364_v61 = vpop.eup %1363 }
0x1578   :  { %1002 = vrot.lane.b32.xlu0 %v1364_v61, %s1437_s3 }
0x15ea   :  { %v1003_v62 = vpop.permute.xlu0 %1002 }
0x15eb   :  { %v1005_v63 = vmul.f32 %v1003_v62, %v985_v52 }
0x15ed   :  { %v1018_v1 = vrot.slane %v1005_v63, 6 }
0x15ef   :  { %1019 = vrot.lane.b32.xlu1 %v1018_v1, %s1438_s16 }
0x1661   :  { %v1020_v3 = vpop.permute.xlu1 %1019 }
0x1662   :  { %1290 = vmatmul.mubr.msk.f32.vlgmr.msra.gmra.mxu1 %vm65_vm1, %v1020_v3 }
0x1722   :  { %v1089_v5 = vpop.f32.mrf.mxu1 }
0x1723   :  { %v1090_v0 = vadd.f32 %v1129_v2, %v1089_v5 }
0x1724   :  { %v1291_v6 = vpop.f32.mrf.mxu1 }
0x1725   :  { %1094 = vst.msk [vmem:[#allocation7] sm:$0x3] %vm1093_vm5, %v1090_v0 }
0x1726   :  { %1416 = shalt.err (!%p1413_p0)
}
0x1727   :  { %1104 = dma.vmem_to_hbm [thread:$0]  %s1102_s27, 32, %s1689_s6, [#allocation4]  }
0x1728   :  { %1429 = dma.done.wait [#allocation4], 32  }
0x1729   :  { %1430 = vsyncadd [#allocation4], 4294967264 }
0x172a   :  { %1108 = vsyncpa [#allocation3], 1 }
0x172b   :  { %1109 = vsyncpa [#allocation6], 1 }
0x172c   :  { %1110 = vsyncpa [#allocation4], 1 }

</bundles_post_ra>
